<compile_context>
chip_gen: v6e
topology: v6e:2x2x1
jax: 0.10.0
libtpu: 0.0.40
codegen_flags: <defaults>
</compile_context>

<pallas_src>
import functools

import jax
import jax.numpy as jnp
from jax.experimental import pallas as pl
from jax.experimental.pallas import tpu as pltpu


def _round_up(x, m):
    return ((x + m - 1) // m) * m


def _chip_config():
    """Per-generation tile sizes, VMEM budget and logits dtype."""
    kind = ""
    try:
        kind = jax.devices()[0].device_kind.lower()
    except Exception:
        pass
    is_v7 = ("v7" in kind) or ("tpu7" in kind)
    old_vpu = any(t in kind for t in ("v2", "v3", "v4", "v5"))
    if is_v7:
        # 64 MiB VMEM total: stay under ~48 MiB scoped; 2 TensorCores per chip ->
        # guarantee >= 2 dst tiles on the "parallel" axis even for small graphs.
        return dict(tq=256, tk=512, vmem=48 * 1024 * 1024,
                    logits_dtype=jnp.bfloat16, split_small_dst=True)
    if old_vpu:
        # v5e and older: no bf16 VPU/EUP -> keep the logits path in f32, but
        # 128 MiB VMEM and lower HBM BW -> bigger dst tiles to cut z re-reads.
        return dict(tq=512, tk=512, vmem=64 * 1024 * 1024,
                    logits_dtype=jnp.float32, split_small_dst=False)
    # v6e default: bf16 VPU/EUP available, 128 MiB VMEM.
    return dict(tq=512, tk=512, vmem=64 * 1024 * 1024,
                logits_dtype=jnp.bfloat16, split_small_dst=False)


# ---------------------------------------------------------------------------
# Kernel 1: fused per-layer projection  y = x @ [W_flat | w_al | w_ar]
#   hf_p is a multiple of 128, so both slices below are lane-aligned and both
#   stores are full-width, lane-dense.
# ---------------------------------------------------------------------------
def _proj_kernel(x_ref, w_ref, z_ref, s_ref, *, hf_p):
    y = jnp.dot(x_ref[...], w_ref[...], preferred_element_type=jnp.float32)
    z_ref[...] = y[:, :hf_p].astype(z_ref.dtype)   # per-head features (bf16)
    s_ref[...] = y[:, hf_p:]                       # [el | er | pad] attention terms (f32)


# ---------------------------------------------------------------------------
# Kernel 2: flash-style masked softmax + neighbor aggregation over dense adj
# ---------------------------------------------------------------------------
def _gat_attn_kernel(adj_ref, el_ref, er_ref, z_ref, b_ref, out_ref,
                     m_ref, l_ref, acc_ref, *,
                     num_heads, feat, apply_relu, logits_dtype):
    k = pl.program_id(1)

    @pl.when(k == 0)
    def _():
        # m starts at 0 (>= the -1e30 masked logit); exp(e - m) then underflows to
        # exactly 0 for masked entries, so no second mask select is needed.  Rows
        # with zero in-degree end with l == 0 -> clamped -> bias-only output
        # (matches DGL allow_zero_in_degree semantics).
        m_ref[...] = jnp.zeros_like(m_ref)
        l_ref[...] = jnp.zeros_like(l_ref)
        acc_ref[...] = jnp.zeros_like(acc_ref)

    mask = adj_ref[...] > 0                          # (TQ, TK) bool, shared by all heads
    z = z_ref[...]                                   # (TK, HFp) bf16

    for hh in range(num_heads):                      # static unroll, H is small
        el = el_ref[hh:hh + 1, :].astype(logits_dtype)   # (1, TK)  source logit term
        er = er_ref[:, hh:hh + 1].astype(logits_dtype)   # (TQ, 1)  destination logit term
        e = er + el                                      # (TQ, TK)
        e = jnp.maximum(e, 0.2 * e)                      # LeakyReLU(0.2), DGL default
        e = jnp.where(mask, e, -1e30)

        m_old = m_ref[:, hh:hh + 1]                      # (TQ, 1) f32
        m_new = jnp.maximum(
            m_old, jnp.max(e, axis=-1, keepdims=True).astype(jnp.float32))
        corr = jnp.exp(m_old - m_new)                    # (TQ, 1) f32
        p = jnp.exp(e - m_new.astype(logits_dtype))      # (TQ, TK) logits dtype

        l_ref[:, hh:hh + 1] = corr * l_ref[:, hh:hh + 1] + jnp.sum(
            p, axis=-1, keepdims=True, dtype=jnp.float32)
        m_ref[:, hh:hh + 1] = m_new
        acc_ref[hh] = corr * acc_ref[hh] + jnp.dot(
            p.astype(z.dtype), z[:, hh * feat:(hh + 1) * feat],
            preferred_element_type=jnp.float32)

    @pl.when(k == pl.num_programs(1) - 1)
    def _():
        inv_l = 1.0 / jnp.maximum(l_ref[...], 1e-9)      # (TQ, H) f32, exact divide
        outs = []
        for hh in range(num_heads):
            outs.append(acc_ref[hh] * inv_l[:, hh:hh + 1]
                        + b_ref[:, hh * feat:(hh + 1) * feat])
        o = outs[0] if num_heads == 1 else jnp.concatenate(outs, axis=-1)
        if apply_relu:
            o = jnp.maximum(o, 0.0)
        out_ref[...] = o.astype(out_ref.dtype)           # single lane-dense store


# ---------------------------------------------------------------------------
# Layer wrapper
# ---------------------------------------------------------------------------
def gat_conv_layer(x, adj, w, attn_l, attn_r, bias, *, apply_relu, cfg):
    """Dense-adjacency GATConv layer. Returns lane-dense (N_dst, H*F)."""
    n_dst, n_src = adj.shape
    assert x.shape[0] == n_src
    nh, d_in, f = w.shape
    hf = nh * f
    hf_p = _round_up(hf, 128)          # lane-aligned feature block
    sc_p = _round_up(2 * nh, 128)      # lane-aligned score block

    # ---- fold parameters into one fused, lane-padded weight matrix (bf16) ----
    w_flat = jnp.transpose(w, (1, 0, 2)).reshape(d_in, hf)     # (Din, H*F), head-major
    w_al = jnp.einsum('hdf,hf->dh', w, attn_l)                 # (Din, H)
    w_ar = jnp.einsum('hdf,hf->dh', w, attn_r)                 # (Din, H)
    w_ext = jnp.zeros((d_in, hf_p + sc_p), jnp.float32)
    w_ext = w_ext.at[:, :hf].set(w_flat)
    w_ext = w_ext.at[:, hf_p:hf_p + nh].set(w_al)
    w_ext = w_ext.at[:, hf_p + nh:hf_p + 2 * nh].set(w_ar)
    w_ext = w_ext.astype(jnp.bfloat16)
    bias_flat = bias.reshape(1, hf).astype(jnp.float32)

    # ---- tile sizes (+ v7x: guarantee >= 2 dst tiles for both TensorCores) ----
    tq = _round_up(n_dst, 8) if n_dst <= cfg['tq'] else cfg['tq']
    tk = _round_up(n_src, 8) if n_src <= cfg['tk'] else cfg['tk']
    if cfg['split_small_dst'] and n_dst <= cfg['tq'] and n_dst >= 16:
        tq = _round_up((n_dst + 1) // 2, 8)
    n_dst_p = _round_up(n_dst, tq)
    n_src_p = _round_up(n_src, tk)

    # TODO(synk): for large graphs pre-pad adj/x once outside the layer loop (or
    # mask the ragged tail in-kernel) instead of a per-layer jnp.pad HBM pass.
    adj_i8 = adj if adj.dtype == jnp.int8 else (adj != 0).astype(jnp.int8)
    if (n_dst_p, n_src_p) != (n_dst, n_src):
        adj_i8 = jnp.pad(adj_i8, ((0, n_dst_p - n_dst), (0, n_src_p - n_src)))
    x_bf = x.astype(jnp.bfloat16)       # bf16 MXU path, f32 accumulation in-kernel
    if n_src_p != n_src:
        x_bf = jnp.pad(x_bf, ((0, n_src_p - n_src), (0, 0)))

    # ---- fused projection: one lane-dense bf16 MXU pass over x for all heads ----
    z, scores = pl.pallas_call(
        functools.partial(_proj_kernel, hf_p=hf_p),
        out_shape=(jax.ShapeDtypeStruct((n_src_p, hf_p), jnp.bfloat16),
                   jax.ShapeDtypeStruct((n_src_p, sc_p), jnp.float32)),
        grid=(n_src_p // tk,),
        in_specs=[pl.BlockSpec((tk, d_in), lambda r: (r, 0)),
                  pl.BlockSpec((d_in, hf_p + sc_p), lambda r: (0, 0))],
        out_specs=[pl.BlockSpec((tk, hf_p), lambda r: (r, 0)),
                   pl.BlockSpec((tk, sc_p), lambda r: (r, 0))],
        compiler_params=pltpu.CompilerParams(
            dimension_semantics=("parallel",),
            vmem_limit_bytes=cfg['vmem']),
    )(x_bf, w_ext)

    el = jnp.transpose(scores[:, :nh])          # (H, N_src_p): row per head (no in-kernel transpose)
    er = scores[:n_dst, nh:2 * nh]              # (N_dst, H): dst nodes = src prefix (DGL block)
    if n_dst_p != n_dst:
        er = jnp.pad(er, ((0, n_dst_p - n_dst), (0, 0)))

    # ---- flash-style masked softmax + aggregation ----
    kernel = functools.partial(_gat_attn_kernel, num_heads=nh, feat=f,
                               apply_relu=apply_relu,
                               logits_dtype=cfg['logits_dtype'])
    out = pl.pallas_call(
        kernel,
        out_shape=jax.ShapeDtypeStruct((n_dst_p, hf), jnp.float32),
        grid=(n_dst_p // tq, n_src_p // tk),
        in_specs=[
            pl.BlockSpec((tq, tk), lambda i, k: (i, k)),        # adjacency tile (int8)
            pl.BlockSpec((nh, tk), lambda i, k: (0, k)),        # el rows for src tile
            pl.BlockSpec((tq, nh), lambda i, k: (i, 0)),        # er cols for dst tile
            pl.BlockSpec((tk, hf_p), lambda i, k: (k, 0)),      # projected feats (bf16)
            pl.BlockSpec((1, hf), lambda i, k: (0, 0)),         # bias
        ],
        out_specs=pl.BlockSpec((tq, hf), lambda i, k: (i, 0)),  # lane-dense (Ndst, H*F)
        scratch_shapes=[
            pltpu.VMEM((tq, nh), jnp.float32),                  # running max m
            pltpu.VMEM((tq, nh), jnp.float32),                  # running denom l
            pltpu.VMEM((nh, tq, f), jnp.float32),               # running weighted sum
        ],
        compiler_params=pltpu.CompilerParams(
            dimension_semantics=("parallel", "arbitrary"),
            vmem_limit_bytes=cfg['vmem']),
    )(adj_i8, el, er, z, bias_flat)

    return out[:n_dst] if n_dst_p != n_dst else out


class GAT:
    """JAX/Pallas port of the PyTorch GAT module (forward only, eval mode)."""

    def __init__(self, in_size, hid_size, out_size, n_heads, key):
        n_layers = len(n_heads)
        assert n_heads[-1] == 1
        self.n_layers = n_layers
        self.hid_size = hid_size
        self.out_size = out_size
        self.n_heads = n_heads
        self.cfg = _chip_config()
        self.params = []
        for i in range(n_layers):
            in_dim = in_size if i == 0 else hid_size * n_heads[i - 1]
            out_dim = out_size if i == n_layers - 1 else hid_size
            h = n_heads[i]
            key, k_w, k_al, k_ar = jax.random.split(key, 4)
            scale = 1.0 / jnp.sqrt(jnp.float32(in_dim))
            w = jax.random.normal(k_w, (h, in_dim, out_dim), jnp.float32) * scale
            attn_l = jax.random.normal(k_al, (h, out_dim), jnp.float32) * 0.1
            attn_r = jax.random.normal(k_ar, (h, out_dim), jnp.float32) * 0.1
            bias = jnp.zeros((h, out_dim), jnp.float32)
            self.params.append((w, attn_l, attn_r, bias))

    def forward(self, blocks, inputs):
        h = inputs
        for i, (params, adj) in enumerate(zip(self.params, blocks)):
            w, attn_l, attn_r, bias = params
            is_last = (i == self.n_layers - 1)
            out = gat_conv_layer(h, adj, w, attn_l, attn_r, bias,
                                 apply_relu=not is_last, cfg=self.cfg)   # (N_dst, H*F)
            if is_last:
                nh = self.n_heads[i]
                out = out.reshape(out.shape[0], nh, -1).mean(axis=1)
            h = out                                                      # == flatten(1) layout
        return h


# ---------------------------------------------------------------------------
# Pure-JAX f32 reference (for a loose numerical check)
# ---------------------------------------------------------------------------
def _gat_reference(params, blocks, x, n_layers):
    h = x
    for i, ((w, al, ar, b), adj) in enumerate(zip(params, blocks)):
        mask = (adj != 0)
        z = jnp.einsum('nd,hdf->nhf', h, w)
        el = jnp.einsum('nhf,hf->nh', z, al)
        er = jnp.einsum('nhf,hf->nh', z, ar)
        e = er[:, None, :] + el[None, :, :]          # (Ndst, Nsrc, H)
        e = jnp.where(e > 0, e, 0.2 * e)
        e = jnp.where(mask[:, :, None], e, -1e30)
        m = jnp.max(e, axis=1, keepdims=True)
        p = jnp.where(mask[:, :, None], jnp.exp(e - m), 0.0)
        denom = jnp.maximum(jnp.sum(p, axis=1, keepdims=True), 1e-9)
        alpha = p / denom
        out = jnp.einsum('ijh,jhf->ihf', alpha, z) + b[None, :, :]
        if i == n_layers - 1:
            out = out.mean(axis=1)
        else:
            out = jnp.maximum(out, 0.0).reshape(out.shape[0], -1)
        h = out
    return h


if __name__ == "__main__":
    key = jax.random.PRNGKey(0)

    # Small synthetic problem: 32 nodes, 16 input features, 2 GAT layers.
    N = 32
    in_size, hid_size, out_size = 16, 8, 4
    n_heads = (4, 1)

    key, k_feat, k_adj = jax.random.split(key, 3)
    x = jax.random.normal(k_feat, (N, in_size), jnp.float32)

    # Dense adjacency (dst x src) as int8 with self-loops; same graph as both blocks.
    adj = (jax.random.uniform(k_adj, (N, N)) < 0.2)
    adj = jnp.logical_or(adj, jnp.eye(N, dtype=bool)).astype(jnp.int8)
    blocks = [adj, adj]

    model = GAT(in_size, hid_size, out_size, n_heads, key)
    try:
        out = jax.block_until_ready(model.forward(blocks, x))
    except Exception:
        # Safety net: if the bf16 logits path does not lower on this chip/toolchain,
        # retry with the f32 logits path (always supported).
        model.cfg = dict(model.cfg, logits_dtype=jnp.float32)
        out = jax.block_until_ready(model.forward(blocks, x))

    assert out.shape == (N, out_size), out.shape
    assert bool(jnp.all(jnp.isfinite(out)))

    ref = _gat_reference(model.params, blocks, x, model.n_layers)
    err = float(jnp.max(jnp.abs(out - ref)))
    # bf16 projection + (on v6e/v7x) bf16 logits vs a pure-f32 reference.
    assert err < 1e-1, f"max abs error vs f32 reference: {err}"
    print("KERNEL_OK")
</pallas_src>

<mosaic_0001>
module attributes {stable_mosaic.version = 11 : i64} {
  func.func @_proj_kernel(%arg0: i32, %arg1: memref<32x16xbf16, #tpu.memory_space<vmem>>, %arg2: memref<16x256xbf16, #tpu.memory_space<vmem>>, %arg3: memref<32x128xbf16, #tpu.memory_space<vmem>>, %arg4: memref<32x128xf32, #tpu.memory_space<vmem>>) attributes {dimension_semantics = [#tpu.dimension_semantics<parallel>], iteration_bounds = array<i64: 1>, scalar_prefetch = 0 : i64, scratch_operands = 0 : i64, tpu.core_type = #tpu.core_type<tc>, window_params = [{transform_indices = @transform_0, window_bounds = array<i64: 32, 16>}, {pipeline_mode = #tpu.pipeline_mode<synchronous>, transform_indices = @transform_1, window_bounds = array<i64: 16, 256>}, {transform_indices = @transform_2, window_bounds = array<i64: 32, 128>}, {transform_indices = @transform_3, window_bounds = array<i64: 32, 128>}]} {
    %c0 = arith.constant 0 : index
    %c0_0 = arith.constant 0 : index
    %0 = vector.load %arg1[%c0, %c0_0] : memref<32x16xbf16, #tpu.memory_space<vmem>>, vector<32x16xbf16>
    %c0_1 = arith.constant 0 : index
    %c0_2 = arith.constant 0 : index
    %1 = vector.load %arg2[%c0_1, %c0_2] : memref<16x256xbf16, #tpu.memory_space<vmem>>, vector<16x256xbf16>
    %cst = arith.constant dense<0.000000e+00> : vector<32x256xf32>
    %2 = tpu.matmul %0, %1, %cst {dimension_numbers = #tpu.dot_dimension_numbers<[1], [0], [0], [1], [0, 0, 1, 1], [], []>} : vector<32x16xbf16>, vector<16x256xbf16>, vector<32x256xf32> -> vector<32x256xf32>
    %3 = vector.extract_strided_slice %2 {offsets = [0, 0], sizes = [32, 128], strides = [1, 1]} : vector<32x256xf32> to vector<32x128xf32>
    %4 = arith.truncf %3 : vector<32x128xf32> to vector<32x128xbf16>
    %c0_3 = arith.constant 0 : index
    %c0_4 = arith.constant 0 : index
    %5 = vector.load %arg3[%c0_3, %c0_4] : memref<32x128xbf16, #tpu.memory_space<vmem>>, vector<32x128xbf16>
    tpu.vector_store %arg3[%c0_3, %c0_4], %4 {strides = array<i32>} : memref<32x128xbf16, #tpu.memory_space<vmem>>, vector<32x128xbf16>,
    %6 = vector.extract_strided_slice %2 {offsets = [0, 128], sizes = [32, 128], strides = [1, 1]} : vector<32x256xf32> to vector<32x128xf32>
    %c0_5 = arith.constant 0 : index
    %c0_6 = arith.constant 0 : index
    %7 = vector.load %arg4[%c0_5, %c0_6] : memref<32x128xf32, #tpu.memory_space<vmem>>, vector<32x128xf32>
    tpu.vector_store %arg4[%c0_5, %c0_6], %6 {strides = array<i32>} : memref<32x128xf32, #tpu.memory_space<vmem>>, vector<32x128xf32>,
    return
  }
  func.func @transform_0(%arg0: i32) -> (i32, i32) {
    %c0_i32 = arith.constant 0 : i32
    %c0_i32_0 = arith.constant 0 : i32
    return %arg0, %c0_i32 : i32, i32
  }
  func.func @transform_1(%arg0: i32) -> (i32, i32) {
    %c0_i32 = arith.constant 0 : i32
    %c0_i32_0 = arith.constant 0 : i32
    %c0_i32_1 = arith.constant 0 : i32
    return %c0_i32, %c0_i32_0 : i32, i32
  }
  func.func @transform_2(%arg0: i32) -> (i32, i32) {
    %c0_i32 = arith.constant 0 : i32
    %c0_i32_0 = arith.constant 0 : i32
    return %arg0, %c0_i32 : i32, i32
  }
  func.func @transform_3(%arg0: i32) -> (i32, i32) {
    %c0_i32 = arith.constant 0 : i32
    %c0_i32_0 = arith.constant 0 : i32
    return %arg0, %c0_i32 : i32, i32
  }
}

module attributes {stable_mosaic.version = 11 : i64} {
  func.func @_proj_kernel(%arg0: i32, %arg1: memref<32x16xbf16, #tpu.memory_space<vmem>>, %arg2: memref<16x256xbf16, #tpu.memory_space<vmem>>, %arg3: memref<32x128xbf16, #tpu.memory_space<vmem>>, %arg4: memref<32x128xf32, #tpu.memory_space<vmem>>) attributes {dimension_semantics = [#tpu.dimension_semantics<parallel>], iteration_bounds = array<i64: 1>, scalar_prefetch = 0 : i64, scratch_operands = 0 : i64, tpu.core_type = #tpu.core_type<tc>, window_params = [{transform_indices = @transform_0, window_bounds = array<i64: 32, 16>}, {pipeline_mode = #tpu.pipeline_mode<synchronous>, transform_indices = @transform_1, window_bounds = array<i64: 16, 256>}, {transform_indices = @transform_2, window_bounds = array<i64: 32, 128>}, {transform_indices = @transform_3, window_bounds = array<i64: 32, 128>}]} {
    %c0 = arith.constant 0 : index
    %c0_0 = arith.constant 0 : index
    %0 = vector.load %arg1[%c0, %c0_0] : memref<32x16xbf16, #tpu.memory_space<vmem>>, vector<32x16xbf16>
    %c0_1 = arith.constant 0 : index
    %c0_2 = arith.constant 0 : index
    %1 = vector.load %arg2[%c0_1, %c0_2] : memref<16x256xbf16, #tpu.memory_space<vmem>>, vector<16x256xbf16>
    %cst = arith.constant dense<0.000000e+00> : vector<32x256xf32>
    %2 = tpu.matmul %0, %1, %cst {dimension_numbers = #tpu.dot_dimension_numbers<[1], [0], [0], [1], [0, 0, 1, 1], [], []>} : vector<32x16xbf16>, vector<16x256xbf16>, vector<32x256xf32> -> vector<32x256xf32>
    %3 = vector.extract_strided_slice %2 {offsets = [0, 0], sizes = [32, 128], strides = [1, 1]} : vector<32x256xf32> to vector<32x128xf32>
    %4 = arith.truncf %3 : vector<32x128xf32> to vector<32x128xbf16>
    %c0_3 = arith.constant 0 : index
    %c0_4 = arith.constant 0 : index
    %5 = vector.load %arg3[%c0_3, %c0_4] : memref<32x128xbf16, #tpu.memory_space<vmem>>, vector<32x128xbf16>
    tpu.vector_store %arg3[%c0_3, %c0_4], %4 {strides = array<i32>} : memref<32x128xbf16, #tpu.memory_space<vmem>>, vector<32x128xbf16>,
    %6 = vector.extract_strided_slice %2 {offsets = [0, 128], sizes = [32, 128], strides = [1, 1]} : vector<32x256xf32> to vector<32x128xf32>
    %c0_5 = arith.constant 0 : index
    %c0_6 = arith.constant 0 : index
    %7 = vector.load %arg4[%c0_5, %c0_6] : memref<32x128xf32, #tpu.memory_space<vmem>>, vector<32x128xf32>
    tpu.vector_store %arg4[%c0_5, %c0_6], %6 {strides = array<i32>} : memref<32x128xf32, #tpu.memory_space<vmem>>, vector<32x128xf32>,
    return
  }
  func.func @transform_0(%arg0: i32) -> (i32, i32) {
    %c0_i32 = arith.constant 0 : i32
    %c0_i32_0 = arith.constant 0 : i32
    return %arg0, %c0_i32 : i32, i32
  }
  func.func @transform_1(%arg0: i32) -> (i32, i32) {
    %c0_i32 = arith.constant 0 : i32
    %c0_i32_0 = arith.constant 0 : i32
    %c0_i32_1 = arith.constant 0 : i32
    return %c0_i32, %c0_i32_0 : i32, i32
  }
  func.func @transform_2(%arg0: i32) -> (i32, i32) {
    %c0_i32 = arith.constant 0 : i32
    %c0_i32_0 = arith.constant 0 : i32
    return %arg0, %c0_i32 : i32, i32
  }
  func.func @transform_3(%arg0: i32) -> (i32, i32) {
    %c0_i32 = arith.constant 0 : i32
    %c0_i32_0 = arith.constant 0 : i32
    return %arg0, %c0_i32 : i32, i32
  }
}

</mosaic_0001>

<bundles_post_ra>
// kernel: tpu_custom_call.1
= control target key start
LH: loop header
LB: loop body
LE: loop exit
PB: predicated region body
PF: predicated region fallthrough
CT: control target
= control target key end

     0   :  { %9 = vsyncpa [#allocation3], 0  ;;  %v241_v2 = vmov 0   ;;  %vm42_vm0 = vcmask 130048   ;;  %s293_s0 = inlined_call_operand.vmem [shape: bf16[32,16], index: 0, kind: input, shape index: {}]   ;;  %s294_s1 = inlined_call_operand.vmem [shape: bf16[16,256], index: 1, kind: input, shape index: {}]   ;;  %s295_s2 = inlined_call_operand.hbm [shape: bf16[32,128], index: 2, kind: output, shape index: {0}]   ;;  %s296_s3 = inlined_call_operand.hbm [shape: f32[32,128], index: 3, kind: output, shape index: {1}]  }
   0x1   :  { %v192_v0 = vld [vmem:[%s294_s1 + $0x4] ss:$8 sps:$4 sm:$0xff]   ;;  %v194_v1 = vld [vmem:[%s294_s1] ss:$8 sps:$4 sm:$0xff]   ;;  %81 = vmatprep.mubr.bf16.mxu0 %v241_v2  ;;  %91 = vmatprep.mubr.bf16.mxu1 %v241_v2 }
   0x2   :  { %63 = vmatprep.subr.bf16.mxu0 %v192_v0  ;;  %183 = vmatprep.subr.bf16.mxu1 %v192_v0  ;;  %v195_v3 = vld [vmem:[%s293_s0] sm:$0xff]   ;;  %v196_v4 = vld [vmem:[%s293_s0 + $0x8] sm:$0xff]  }
   0x3   :  { %64 = vmatpush1.bf16.msra.mxu0 %v194_v1  ;;  %184 = vmatpush1.bf16.msra.mxu1 %v194_v1 }
   0x4   :  { %10 = vsyncpa [#allocation5], 0  ;;  %s242_s1 = smov [#allocation2]   ;;  %s243_s21 = smov [#allocation4]  }
   0x5   :  { %s131_s20 = sshll.u32 %s242_s1, 4  ;;  %s143_s22 = sshll.u32 %s243_s21, 4  ;;  %s132_s20 = int_to_ptr.vmem [resolvable:$true] %s131_s20  ;;  %s280_s22 = int_to_ptr.vmem [resolvable:$true] %s143_s22 }
   0x6   :  { %162 = vmatmul.mubr.msk.bf16.vlgmr.msra.gmra.mxu0 %vm42_vm0, %v195_v3  ;;  %163 = vmatmul.mubr.msk.bf16.vlgmr.msra.gmra.mxu1 %vm42_vm0, %v196_v4  ;;  %s197_s0 = scalar_lea.vmem %s132_s20, 256  ;;  %p202_p1 = scmp.lt.s32.totalorder %s132_s20, %s132_s20 }
   0x7   :  { %p198_p0 = scmp.ne.s32.totalorder %s132_s20, %s197_s0  ;;  %p203_p2 = scmp.lt.s32.totalorder %s197_s0, %s197_s0 }
   0x9   :  { %p204_p3 = por %p203_p2, %p202_p1 }
   0xb   :  { %p205_p4 = pnand %p204_p3, %p198_p0 }
  0xc6   :  { %v83_v5 = vpop.f32.mrf.mxu0  ;;  %v93_v6 = vpop.f32.mrf.mxu1 }
  0xc8   :  { %v85_v7 = vpop.f32.mrf.mxu0  ;;  %v95_v8 = vpop.f32.mrf.mxu1 }
  0xc9   :  { %122 = vst [vmem:[#allocation4] sm:$0xff] %v85_v7  ;;  %124 = vst [vmem:[#allocation4 + $0x10] sm:$0xff] %v95_v8 }
  0xca   :  { %v87_v9 = vpop.f32.mrf.mxu0  ;;  %v97_v10 = vpop.f32.mrf.mxu1 }
  0xcb   :  { %v175_v11 = vpack.c.bf16 %v87_v9, %v83_v5  ;;  %v180_v12 = vpack.c.bf16 %v97_v10, %v93_v6 }
  0xcc   :  { %v89_v13 = vpop.f32.mrf.mxu0  ;;  %v99_v14 = vpop.f32.mrf.mxu1 }
  0xcd   :  { %176 = vst [vmem:[#allocation2] sm:$0xff] %v175_v11   ;;  %182 = vst [vmem:[#allocation2 + $0x8] sm:$0xff] %v180_v12  }
  0xce   :  { %123 = vst [vmem:[#allocation4 + $0x8] sm:$0xff] %v89_v13  ;;  %125 = vst [vmem:[#allocation4 + $0x18] sm:$0xff] %v99_v14 }
  0xcf   :  { %208 = shalt.err (!%p205_p4)
}
  0xd0   :  { %s244_s23 = smov 64   ;;  %s245_s24 = smov 4  }
  0xd1   :  { %137 = dma.vmem_to_hbm [thread:$0]  %s132_s20, 256, %s295_s2, [#allocation3], %s244_s23, %s244_s23, %s245_s24  }
  0xd2   :  { %s217_s27 = scalar_lea.vmem %s280_s22, 512  ;;  %p222_p6 = scmp.lt.s32.totalorder %s280_s22, %s280_s22 }
  0xd3   :  { %p218_p5 = scmp.ne.s32.totalorder %s280_s22, %s217_s27  ;;  %p223_p7 = scmp.lt.s32.totalorder %s217_s27, %s217_s27 }
  0xd5   :  { %p224_p8 = por %p223_p7, %p222_p6 }
  0xd7   :  { %p225_p9 = pnand %p224_p8, %p218_p5 }
  0xd9   :  { %228 = shalt.err (!%p225_p9)
}
  0xda   :  { %s246_s28 = smov 128   ;;  %s247_s29 = smov 8  }
  0xdb   :  { %149 = dma.vmem_to_hbm [thread:$0]  %s280_s22, 512, %s296_s3, [#allocation5], %s246_s28, %s246_s28, %s247_s29  }
  0xdc   :  { %237 = dma.done.wait [#allocation3], 256  }
  0xdd   :  { %238 = vsyncadd [#allocation3], 4294967040 }
  0xde   :  { %239 = dma.done.wait [#allocation5], 512  }
  0xdf   :  { %240 = vsyncadd [#allocation5], 4294966784 }
  0xe0   :  { %156 = vsyncpa [#allocation3], 1 }
  0xe1   :  { %157 = vsyncpa [#allocation5], 1 }

// kernel: tpu_custom_call.1
= control target key start
LH: loop header
LB: loop body
LE: loop exit
PB: predicated region body
PF: predicated region fallthrough
CT: control target
= control target key end

     0   :  { %9 = vsyncpa [#allocation3], 0  ;;  %v241_v2 = vmov 0   ;;  %vm42_vm0 = vcmask 130048   ;;  %s293_s0 = inlined_call_operand.vmem [shape: bf16[32,16], index: 0, kind: input, shape index: {}]   ;;  %s294_s1 = inlined_call_operand.vmem [shape: bf16[16,256], index: 1, kind: input, shape index: {}]   ;;  %s295_s2 = inlined_call_operand.hbm [shape: bf16[32,128], index: 2, kind: output, shape index: {0}]   ;;  %s296_s3 = inlined_call_operand.hbm [shape: f32[32,128], index: 3, kind: output, shape index: {1}]  }
   0x1   :  { %v192_v0 = vld [vmem:[%s294_s1 + $0x4] ss:$8 sps:$4 sm:$0xff]   ;;  %v194_v1 = vld [vmem:[%s294_s1] ss:$8 sps:$4 sm:$0xff]   ;;  %81 = vmatprep.mubr.bf16.mxu0 %v241_v2  ;;  %91 = vmatprep.mubr.bf16.mxu1 %v241_v2 }
   0x2   :  { %63 = vmatprep.subr.bf16.mxu0 %v192_v0  ;;  %183 = vmatprep.subr.bf16.mxu1 %v192_v0  ;;  %v195_v3 = vld [vmem:[%s293_s0] sm:$0xff]   ;;  %v196_v4 = vld [vmem:[%s293_s0 + $0x8] sm:$0xff]  }
   0x3   :  { %64 = vmatpush1.bf16.msra.mxu0 %v194_v1  ;;  %184 = vmatpush1.bf16.msra.mxu1 %v194_v1 }
   0x4   :  { %10 = vsyncpa [#allocation5], 0  ;;  %s242_s1 = smov [#allocation2]   ;;  %s243_s21 = smov [#allocation4]  }
   0x5   :  { %s131_s20 = sshll.u32 %s242_s1, 4  ;;  %s143_s22 = sshll.u32 %s243_s21, 4  ;;  %s132_s20 = int_to_ptr.vmem [resolvable:$true] %s131_s20  ;;  %s280_s22 = int_to_ptr.vmem [resolvable:$true] %s143_s22 }
   0x6   :  { %162 = vmatmul.mubr.msk.bf16.vlgmr.msra.gmra.mxu0 %vm42_vm0, %v195_v3  ;;  %163 = vmatmul.mubr.msk.bf16.vlgmr.msra.gmra.mxu1 %vm42_vm0, %v196_v4  ;;  %s197_s0 = scalar_lea.vmem %s132_s20, 256  ;;  %p202_p1 = scmp.lt.s32.totalorder %s132_s20, %s132_s20 }
   0x7   :  { %p198_p0 = scmp.ne.s32.totalorder %s132_s20, %s197_s0  ;;  %p203_p2 = scmp.lt.s32.totalorder %s197_s0, %s197_s0 }
   0x9   :  { %p204_p3 = por %p203_p2, %p202_p1 }
   0xb   :  { %p205_p4 = pnand %p204_p3, %p198_p0 }
  0xc6   :  { %v83_v5 = vpop.f32.mrf.mxu0  ;;  %v93_v6 = vpop.f32.mrf.mxu1 }
  0xc8   :  { %v85_v7 = vpop.f32.mrf.mxu0  ;;  %v95_v8 = vpop.f32.mrf.mxu1 }
  0xc9   :  { %122 = vst [vmem:[#allocation4] sm:$0xff] %v85_v7  ;;  %124 = vst [vmem:[#allocation4 + $0x10] sm:$0xff] %v95_v8 }
  0xca   :  { %v87_v9 = vpop.f32.mrf.mxu0  ;;  %v97_v10 = vpop.f32.mrf.mxu1 }
  0xcb   :  { %v175_v11 = vpack.c.bf16 %v87_v9, %v83_v5  ;;  %v180_v12 = vpack.c.bf16 %v97_v10, %v93_v6 }
  0xcc   :  { %v89_v13 = vpop.f32.mrf.mxu0  ;;  %v99_v14 = vpop.f32.mrf.mxu1 }
  0xcd   :  { %176 = vst [vmem:[#allocation2] sm:$0xff] %v175_v11   ;;  %182 = vst [vmem:[#allocation2 + $0x8] sm:$0xff] %v180_v12  }
  0xce   :  { %123 = vst [vmem:[#allocation4 + $0x8] sm:$0xff] %v89_v13  ;;  %125 = vst [vmem:[#allocation4 + $0x18] sm:$0xff] %v99_v14 }
  0xcf   :  { %208 = shalt.err (!%p205_p4)
}
  0xd0   :  { %s244_s23 = smov 64   ;;  %s245_s24 = smov 4  }
  0xd1   :  { %137 = dma.vmem_to_hbm [thread:$0]  %s132_s20, 256, %s295_s2, [#allocation3], %s244_s23, %s244_s23, %s245_s24  }
  0xd2   :  { %s217_s27 = scalar_lea.vmem %s280_s22, 512  ;;  %p222_p6 = scmp.lt.s32.totalorder %s280_s22, %s280_s22 }
  0xd3   :  { %p218_p5 = scmp.ne.s32.totalorder %s280_s22, %s217_s27  ;;  %p223_p7 = scmp.lt.s32.totalorder %s217_s27, %s217_s27 }
  0xd5   :  { %p224_p8 = por %p223_p7, %p222_p6 }
  0xd7   :  { %p225_p9 = pnand %p224_p8, %p218_p5 }
  0xd9   :  { %228 = shalt.err (!%p225_p9)
}
  0xda   :  { %s246_s28 = smov 128   ;;  %s247_s29 = smov 8  }
  0xdb   :  { %149 = dma.vmem_to_hbm [thread:$0]  %s280_s22, 512, %s296_s3, [#allocation5], %s246_s28, %s246_s28, %s247_s29  }
  0xdc   :  { %237 = dma.done.wait [#allocation3], 256  }
  0xdd   :  { %238 = vsyncadd [#allocation3], 4294967040 }
  0xde   :  { %239 = dma.done.wait [#allocation5], 512  }
  0xdf   :  { %240 = vsyncadd [#allocation5], 4294966784 }
  0xe0   :  { %156 = vsyncpa [#allocation3], 1 }
  0xe1   :  { %157 = vsyncpa [#allocation5], 1 }

</bundles_post_ra>
